<compile_context>
chip_gen: v6e
topology: v6e:2x2x1
jax: 0.10.0
libtpu: 0.0.40
codegen_flags: <defaults>
</compile_context>

<pallas_src>
import jax
import jax.numpy as jnp
from jax.experimental import pallas as pl
from jax.experimental.pallas import tpu as pltpu


def _embedding_mlp_kernel(x_ref, w1_ref, b1_ref, w2t_ref, b2_ref, o_ref):
    x = x_ref[...]                                                   # (TB, D_in) f32

    # ---- Linear(input_dim, 2): hidden dim is 2, so compute it on the VPU/XLU
    #      (broadcast-mul + cross-lane reduce) instead of a <2%-utilized MXU matmul.
    h0 = jnp.sum(x * w1_ref[0:1, :], axis=-1, keepdims=True) + b1_ref[0]   # (TB, 1)
    h1 = jnp.sum(x * w1_ref[1:2, :], axis=-1, keepdims=True) + b1_ref[1]   # (TB, 1)

    # ---- AiLU: pos*(h+1) + neg*h  ==  h + [h >= 0]   (tie at 0 -> exactly 1.0)
    a0 = h0 + (h0 >= 0.0).astype(jnp.float32)
    a1 = h1 + (h1 >= 0.0).astype(jnp.float32)

    # ---- Linear(2, output_dim): K=2 -> two VPU broadcast-FMAs, no MXU.
    out = a0 * w2t_ref[0:1, :] + a1 * w2t_ref[1:2, :] + b2_ref[...]  # (TB, D_out)
    o_ref[...] = out.astype(o_ref.dtype)


def embedding_net_mlp(x, w1, b1, w2, b2, *, vmem_tile_budget_bytes=8 << 20):
    """Forward pass of EmbeddingNetMLP.

    x  : (B, input_dim)  float32
    w1 : (2, input_dim)  float32   (PyTorch Linear weight layout: (out, in))
    b1 : (2,)            float32
    w2 : (output_dim, 2) float32
    b2 : (output_dim,)   float32
    returns: (B, output_dim) float32
    """
    B, input_dim = x.shape
    hidden = w1.shape[0]
    output_dim = w2.shape[0]
    assert hidden == 2, "EmbeddingNetMLP has a fixed hidden width of 2"

    x = x.astype(jnp.float32)
    w1 = w1.astype(jnp.float32)
    b1 = b1.astype(jnp.float32)                      # (2,)  -> SMEM scalars
    w2t = jnp.transpose(w2).astype(jnp.float32)      # (2, output_dim)
    b2r = b2.reshape(1, output_dim).astype(jnp.float32)

    # --- batch tile: as many rows as a few-MiB double-buffered budget allows ---
    bytes_per_row = 4 * (input_dim + output_dim)     # x row in + out row out (f32)
    tb = max(8, (vmem_tile_budget_bytes // (2 * bytes_per_row)) // 8 * 8)
    if B <= tb:
        tb = B                                       # single tile, full-extent block
        b_pad = B
    else:
        b_pad = pl.cdiv(B, tb) * tb
    if b_pad != B:
        x = jnp.pad(x, ((0, b_pad - B), (0, 0)))
    grid = (b_pad // tb,)

    # Raise the scoped-VMEM limit only when the tiles actually need it
    # (defaults: 16 MiB v5e, 32 MiB v6e/v7x; v7x has only 64 MiB physical).
    est_vmem = 2 * tb * bytes_per_row + (1 << 20)    # double-buffered in+out + slack
    vmem_limit = min(2 * est_vmem, 48 * 1024 * 1024) if est_vmem > 12 * 1024 * 1024 else None

    compiler_params = pltpu.CompilerParams(
        dimension_semantics=("parallel",),           # shard batch axis across TCs (v7x)
        vmem_limit_bytes=vmem_limit,
    )

    out = pl.pallas_call(
        _embedding_mlp_kernel,
        out_shape=jax.ShapeDtypeStruct((b_pad, output_dim), jnp.float32),
        grid=grid,
        in_specs=[
            pl.BlockSpec((tb, input_dim), lambda i: (i, 0)),        # x: batch-tiled
            pl.BlockSpec((hidden, input_dim), lambda i: (0, 0)),    # w1: VMEM-resident
            pl.BlockSpec(memory_space=pltpu.MemorySpace.SMEM),      # b1: SMEM scalars
            pl.BlockSpec((hidden, output_dim), lambda i: (0, 0)),   # w2^T: VMEM-resident
            pl.BlockSpec((1, output_dim), lambda i: (0, 0)),        # b2: VMEM-resident
        ],
        out_specs=pl.BlockSpec((tb, output_dim), lambda i: (i, 0)),
        compiler_params=compiler_params,
    )(x, w1, b1, w2t, b2r)

    return out[:B] if b_pad != B else out


def _reference(x, w1, b1, w2, b2):
    h = x @ w1.T + b1
    pos = (h >= 0).astype(jnp.float32)
    neg = (h <= 0).astype(jnp.float32)
    a = pos * (h + 1.0) + neg * h
    return a @ w2.T + b2


if __name__ == "__main__":
    key = jax.random.PRNGKey(0)
    k_x, k_w1, k_b1, k_w2, k_b2 = jax.random.split(key, 5)

    batch = 8
    input_dim = 16
    hidden = 2          # fixed by the module definition
    output_dim = 8

    # Deterministic parameter init mimicking PyTorch Linear default:
    # U(-1/sqrt(fan_in), 1/sqrt(fan_in))
    lim1 = 1.0 / (input_dim ** 0.5)
    lim2 = 1.0 / (hidden ** 0.5)
    w1 = jax.random.uniform(k_w1, (hidden, input_dim), jnp.float32, -lim1, lim1)
    b1 = jax.random.uniform(k_b1, (hidden,), jnp.float32, -lim1, lim1)
    w2 = jax.random.uniform(k_w2, (output_dim, hidden), jnp.float32, -lim2, lim2)
    b2 = jax.random.uniform(k_b2, (output_dim,), jnp.float32, -lim2, lim2)

    x = jax.random.normal(k_x, (batch, input_dim), jnp.float32)

    # Main check: single-tile path.
    out = jax.block_until_ready(embedding_net_mlp(x, w1, b1, w2, b2))
    ref = _reference(x, w1, b1, w2, b2)
    assert out.shape == (batch, output_dim)
    assert jnp.allclose(out, ref, atol=1e-5, rtol=1e-5), "mismatch vs reference"

    # Secondary check: multi-tile grid + batch padding path (tiny tile budget).
    x_big = jax.random.normal(k_x, (40, input_dim), jnp.float32)
    out_big = jax.block_until_ready(
        embedding_net_mlp(x_big, w1, b1, w2, b2, vmem_tile_budget_bytes=3072))
    ref_big = _reference(x_big, w1, b1, w2, b2)
    assert out_big.shape == (40, output_dim)
    assert jnp.allclose(out_big, ref_big, atol=1e-5, rtol=1e-5), "mismatch vs reference (tiled)"

    print("KERNEL_OK")
</pallas_src>

<mosaic_0001>
module attributes {stable_mosaic.version = 11 : i64} {
  func.func @_embedding_mlp_kernel(%arg0: i32, %arg1: memref<8x16xf32, #tpu.memory_space<vmem>>, %arg2: memref<2x16xf32, #tpu.memory_space<vmem>>, %arg3: memref<2xf32, #tpu.memory_space<smem>>, %arg4: memref<2x8xf32, #tpu.memory_space<vmem>>, %arg5: memref<1x8xf32, #tpu.memory_space<vmem>>, %arg6: memref<8x8xf32, #tpu.memory_space<vmem>>) attributes {dimension_semantics = [#tpu.dimension_semantics<parallel>], iteration_bounds = array<i64: 1>, scalar_prefetch = 0 : i64, scratch_operands = 0 : i64, tpu.core_type = #tpu.core_type<tc>, window_params = [{transform_indices = @transform_0, window_bounds = array<i64: 8, 16>}, {pipeline_mode = #tpu.pipeline_mode<synchronous>, transform_indices = @transform_1, window_bounds = array<i64: 2, 16>}, {transform_indices = @transform_2, window_bounds = array<i64: 2>}, {pipeline_mode = #tpu.pipeline_mode<synchronous>, transform_indices = @transform_3, window_bounds = array<i64: 2, 8>}, {pipeline_mode = #tpu.pipeline_mode<synchronous>, transform_indices = @transform_4, window_bounds = array<i64: 1, 8>}, {transform_indices = @transform_5, window_bounds = array<i64: 8, 8>}]} {
    %c0 = arith.constant 0 : index
    %c0_0 = arith.constant 0 : index
    %0 = vector.load %arg1[%c0, %c0_0] : memref<8x16xf32, #tpu.memory_space<vmem>>, vector<8x16xf32>
    %c0_1 = arith.constant 0 : index
    %c0_2 = arith.constant 0 : index
    %1 = vector.load %arg2[%c0_1, %c0_2] : memref<2x16xf32, #tpu.memory_space<vmem>>, vector<1x16xf32>
    %2 = vector.broadcast %1 : vector<1x16xf32> to vector<8x16xf32>
    %3 = arith.mulf %0, %2 : vector<8x16xf32>
    %cst = arith.constant dense<0.000000e+00> : vector<8xf32>
    %4 = vector.multi_reduction <add>, %3, %cst [1] : vector<8x16xf32> to vector<8xf32>
    %5 = vector.shape_cast %4 : vector<8xf32> to vector<8x1xf32>
    %c0_3 = arith.constant 0 : index
    %6 = memref.load %arg3[%c0_3] : memref<2xf32, #tpu.memory_space<smem>>
    %7 = vector.broadcast %6 : f32 to vector<8x1xf32>
    %8 = arith.addf %5, %7 : vector<8x1xf32>
    %c1 = arith.constant 1 : index
    %c0_4 = arith.constant 0 : index
    %9 = vector.load %arg2[%c1, %c0_4] : memref<2x16xf32, #tpu.memory_space<vmem>>, vector<1x16xf32>
    %10 = vector.broadcast %9 : vector<1x16xf32> to vector<8x16xf32>
    %11 = arith.mulf %0, %10 : vector<8x16xf32>
    %cst_5 = arith.constant dense<0.000000e+00> : vector<8xf32>
    %12 = vector.multi_reduction <add>, %11, %cst_5 [1] : vector<8x16xf32> to vector<8xf32>
    %13 = vector.shape_cast %12 : vector<8xf32> to vector<8x1xf32>
    %c1_6 = arith.constant 1 : index
    %14 = memref.load %arg3[%c1_6] : memref<2xf32, #tpu.memory_space<smem>>
    %15 = vector.broadcast %14 : f32 to vector<8x1xf32>
    %16 = arith.addf %13, %15 : vector<8x1xf32>
    %cst_7 = arith.constant 0.000000e+00 : f32
    %17 = vector.broadcast %cst_7 : f32 to vector<8x1xf32>
    %18 = arith.cmpf oge, %8, %17 : vector<8x1xf32>
    %19 = arith.extui %18 : vector<8x1xi1> to vector<8x1xi32>
    %20 = arith.sitofp %19 : vector<8x1xi32> to vector<8x1xf32>
    %21 = arith.addf %8, %20 : vector<8x1xf32>
    %cst_8 = arith.constant 0.000000e+00 : f32
    %22 = vector.broadcast %cst_8 : f32 to vector<8x1xf32>
    %23 = arith.cmpf oge, %16, %22 : vector<8x1xf32>
    %24 = arith.extui %23 : vector<8x1xi1> to vector<8x1xi32>
    %25 = arith.sitofp %24 : vector<8x1xi32> to vector<8x1xf32>
    %26 = arith.addf %16, %25 : vector<8x1xf32>
    %c0_9 = arith.constant 0 : index
    %c0_10 = arith.constant 0 : index
    %27 = vector.load %arg4[%c0_9, %c0_10] : memref<2x8xf32, #tpu.memory_space<vmem>>, vector<1x8xf32>
    %28 = vector.broadcast %21 : vector<8x1xf32> to vector<8x8xf32>
    %29 = vector.broadcast %27 : vector<1x8xf32> to vector<8x8xf32>
    %30 = arith.mulf %28, %29 : vector<8x8xf32>
    %c1_11 = arith.constant 1 : index
    %c0_12 = arith.constant 0 : index
    %31 = vector.load %arg4[%c1_11, %c0_12] : memref<2x8xf32, #tpu.memory_space<vmem>>, vector<1x8xf32>
    %32 = vector.broadcast %26 : vector<8x1xf32> to vector<8x8xf32>
    %33 = vector.broadcast %31 : vector<1x8xf32> to vector<8x8xf32>
    %34 = arith.mulf %32, %33 : vector<8x8xf32>
    %35 = arith.addf %30, %34 : vector<8x8xf32>
    %c0_13 = arith.constant 0 : index
    %c0_14 = arith.constant 0 : index
    %36 = vector.load %arg5[%c0_13, %c0_14] : memref<1x8xf32, #tpu.memory_space<vmem>>, vector<1x8xf32>
    %37 = vector.broadcast %36 : vector<1x8xf32> to vector<8x8xf32>
    %38 = arith.addf %35, %37 : vector<8x8xf32>
    %c0_15 = arith.constant 0 : index
    %c0_16 = arith.constant 0 : index
    %39 = vector.load %arg6[%c0_15, %c0_16] : memref<8x8xf32, #tpu.memory_space<vmem>>, vector<8x8xf32>
    tpu.vector_store %arg6[%c0_15, %c0_16], %38 {strides = array<i32>} : memref<8x8xf32, #tpu.memory_space<vmem>>, vector<8x8xf32>,
    return
  }
  func.func @transform_0(%arg0: i32) -> (i32, i32) {
    %c0_i32 = arith.constant 0 : i32
    %c0_i32_0 = arith.constant 0 : i32
    return %arg0, %c0_i32 : i32, i32
  }
  func.func @transform_1(%arg0: i32) -> (i32, i32) {
    %c0_i32 = arith.constant 0 : i32
    %c0_i32_0 = arith.constant 0 : i32
    %c0_i32_1 = arith.constant 0 : i32
    return %c0_i32, %c0_i32_0 : i32, i32
  }
  func.func @transform_2(%arg0: i32) -> i32 {
    %c0_i32 = arith.constant 0 : i32
    %c0_i32_0 = arith.constant 0 : i32
    return %c0_i32 : i32
  }
  func.func @transform_3(%arg0: i32) -> (i32, i32) {
    %c0_i32 = arith.constant 0 : i32
    %c0_i32_0 = arith.constant 0 : i32
    %c0_i32_1 = arith.constant 0 : i32
    return %c0_i32, %c0_i32_0 : i32, i32
  }
  func.func @transform_4(%arg0: i32) -> (i32, i32) {
    %c0_i32 = arith.constant 0 : i32
    %c0_i32_0 = arith.constant 0 : i32
    %c0_i32_1 = arith.constant 0 : i32
    return %c0_i32, %c0_i32_0 : i32, i32
  }
  func.func @transform_5(%arg0: i32) -> (i32, i32) {
    %c0_i32 = arith.constant 0 : i32
    %c0_i32_0 = arith.constant 0 : i32
    return %arg0, %c0_i32 : i32, i32
  }
}

</mosaic_0001>

<bundles_post_ra>
// kernel: tpu_custom_call.1
= control target key start
LH: loop header
LB: loop body
LE: loop exit
PB: predicated region body
PF: predicated region fallthrough
CT: control target
= control target key end

     0   :  { %10 = vsyncpa [#allocation3], 0  ;;  %s281_s0 = inlined_call_operand.hbm [shape: f32[8,16], index: 0, kind: input, shape index: {}]   ;;  %s282_s1 = inlined_call_operand.hbm [shape: f32[2,16], index: 1, kind: input, shape index: {}]   ;;  %s283_s2 = inlined_call_operand.vmem [shape: f32[2], index: 2, kind: input, shape index: {}]   ;;  %s284_s3 = inlined_call_operand.vmem [shape: f32[2,8], index: 3, kind: input, shape index: {}]   ;;  %s285_s4 = inlined_call_operand.vmem [shape: f32[1,8], index: 4, kind: input, shape index: {}]   ;;  %s286_s5 = inlined_call_operand.hbm [shape: f32[8,8], index: 5, kind: output, shape index: {}]  }
   0x1   :  { %11 = vsyncpa [#allocation7], 0 }
   0x2   :  { %12 = vsyncpa [#allocation5], 0 }
   0x3   :  { %13 = vsyncpa [#allocation4], 0  ;;  %s225_s18 = smov [#allocation2]   ;;  %s226_s20 = smov [#allocation6]  }
   0x4   :  { %s20_s19 = sshll.u32 %s225_s18, 4  ;;  %s30_s21 = sshll.u32 %s226_s20, 4  ;;  %s21_s19 = int_to_ptr.vmem [resolvable:$true] %s20_s19  ;;  %s31_s21 = int_to_ptr.vmem [resolvable:$true] %s30_s21 }
   0x5   :  { %s153_s22 = scalar_lea.vmem %s21_s19, 128  ;;  %p158_p1 = scmp.lt.s32.totalorder %s21_s19, %s21_s19 }
   0x6   :  { %p154_p0 = scmp.ne.s32.totalorder %s21_s19, %s153_s22  ;;  %p159_p2 = scmp.lt.s32.totalorder %s153_s22, %s153_s22 }
   0x8   :  { %p160_p3 = por %p159_p2, %p158_p1 }
   0xa   :  { %p161_p4 = pnand %p160_p3, %p154_p0 }
   0xc   :  { %164 = shalt.err (!%p161_p4)
}
   0xd   :  { %23 = dma.hbm_to_vmem [thread:$0]  %s281_s0, 128, %s21_s19, [#allocation3]  }
   0xe   :  { %s173_s25 = scalar_lea.vmem %s31_s21, 32  ;;  %p178_p6 = scmp.lt.s32.totalorder %s31_s21, %s31_s21 }
   0xf   :  { %p174_p5 = scmp.ne.s32.totalorder %s31_s21, %s173_s25  ;;  %p179_p7 = scmp.lt.s32.totalorder %s173_s25, %s173_s25 }
  0x11   :  { %p180_p8 = por %p179_p7, %p178_p6 }
  0x13   :  { %p181_p9 = pnand %p180_p8, %p174_p5 }
  0x15   :  { %184 = shalt.err (!%p181_p9)
}
  0x16   :  { %33 = dma.hbm_to_vmem [thread:$0]  %s282_s1, 32, %s31_s21, [#allocation7]  }
  0x17   :  { %s40_s30 = sshll.u32 %s283_s2, 4  ;;  %s41_s30 = int_to_ptr.vmem [resolvable:$true] %s40_s30 }
  0x18   :  { %s185_s6 = scalar_lea.vmem %s41_s30, 16  ;;  %p190_p11 = scmp.lt.s32.totalorder %s41_s30, %s41_s30 }
  0x19   :  { %p186_p10 = scmp.ne.s32.totalorder %s41_s30, %s185_s6  ;;  %p191_p12 = scmp.lt.s32.totalorder %s185_s6, %s185_s6 }
  0x1b   :  { %p192_p13 = por %p191_p12, %p190_p11 }
  0x1d   :  { %p193_p0 = pnand %p192_p13, %p186_p10 }
  0x1f   :  { %196 = shalt.err (!%p193_p0)
}
  0x20   :  { %s227_s0 = smov [#allocation8]  }
  0x21   :  { %43 = dma.vmem_to_smem %s41_s30, 16, %s227_s0, [#allocation5]  }
  0x22   :  { %217 = dma.done.wait [#allocation3], 128  }
  0x23   :  { %218 = vsyncadd [#allocation3], 4294967168 }
  0x24   :  { %219 = dma.done.wait [#allocation7], 32  }
  0x25   :  { %220 = vsyncadd [#allocation7], 4294967264 }
  0x26   :  { %221 = dma.done.wait [#allocation5], 16  }
  0x27   :  { %222 = vsyncadd [#allocation5], 4294967280 }
  0x28   :  { %57 = sfence }
  0x29   :  { %v58_v0 = vld [vmem:[#allocation2] sm:$0xff]  ;;  %v132_v1 = vld [vmem:[#allocation6] ss:$0 sm:$0xff]  ;;  %vm65_vm0 = vcmask 130048   ;;  %v133_v2 = vld [vmem:[#allocation6 + $0x1] ss:$0 sm:$0xff] }
  0x2a   :  { %v64_v3 = vmul.f32 %v132_v1, %v58_v0  ;;  %v77_v4 = vmul.f32 %v133_v2, %v58_v0  ;;  %s69_s1 = sld [smem:[#allocation8]]  ;;  %v228_v11 = vmov 0.0   ;;  %v137_v16 = vld [vmem:[%s284_s3] ss:$0 sm:$0xff]  ;;  %v138_v17 = vld [vmem:[%s284_s3 + $0x1] ss:$0 sm:$0xff] }
  0x2b   :  { %s134_s2 = sld [smem:[#allocation8 + $0x1]]  ;;  %v139_v22 = vld [vmem:[%s285_s4] ss:$0 sm:$0xff]  ;;  %s229_s13 = smov [#allocation9]   ;;  %vm113_vm3 = vcmask 64512  }
  0x2c   :  { %v66_v5 = vsel %vm65_vm0, %v64_v3, 0.0  ;;  %v78_v6 = vsel %vm65_vm0, %v77_v4, 0.0  ;;  %s121_s14 = sshll.u32 %s229_s13, 4  ;;  %s122_s14 = int_to_ptr.vmem [resolvable:$true] %s121_s14 }
  0x2d   :  { %67 = vadd.xlane.f32.xlu0 %v66_v5  ;;  %s197_s15 = scalar_lea.vmem %s122_s14, 128  ;;  %p202_p2 = scmp.lt.s32.totalorder %s122_s14, %s122_s14 }
  0x2e   :  { %p198_p1 = scmp.ne.s32.totalorder %s122_s14, %s197_s15  ;;  %p203_p3 = scmp.lt.s32.totalorder %s197_s15, %s197_s15 }
  0x30   :  { %v70_v7 = vstv %s69_s1  ;;  %p204_p4 = por %p203_p3, %p202_p2 }
  0x31   :  { %79 = vadd.xlane.f32.xlu0 %v78_v6  ;;  %v82_v10 = vstv %s134_s2 }
  0x32   :  { %p205_p5 = pnand %p204_p4, %p198_p1 }
  0xb6   :  { %v68_v8 = vpop.xlane.xlu0 %67 }
  0xb7   :  { %v71_v9 = vadd.f32 %v70_v7, %v68_v8 }
  0xb9   :  { %vm84_vm1 = vcmp.ge.f32.partialorder %v71_v9, 0.0 }
  0xba   :  { %v135_v12 = vsel %vm84_vm1, 1.0, %v228_v11  ;;  %v80_v13 = vpop.xlane.xlu0 %79 }
  0xbb   :  { %v83_v14 = vadd.f32 %v82_v10, %v80_v13  ;;  %v87_v15 = vadd.f32 %v135_v12, %v71_v9 }
  0xbd   :  { %vm88_vm2 = vcmp.ge.f32.partialorder %v83_v14, 0.0  ;;  %v97_v20 = vmul.f32 %v137_v16, %v87_v15 }
  0xbe   :  { %v136_v18 = vsel %vm88_vm2, 1.0, %v228_v11 }
  0xbf   :  { %v91_v19 = vadd.f32 %v136_v18, %v83_v14 }
  0xc1   :  { %v103_v21 = vmul.f32 %v138_v17, %v91_v19 }
  0xc3   :  { %v104_v23 = vadd.f32 %v103_v21, %v97_v20 }
  0xc5   :  { %v112_v24 = vadd.f32 %v139_v22, %v104_v23 }
  0xc7   :  { %114 = vst.msk [vmem:[#allocation9] sm:$0xff] %vm113_vm3, %v112_v24 }
  0xc8   :  { %208 = shalt.err (!%p205_p5)
}
  0xc9   :  { %124 = dma.vmem_to_hbm [thread:$0]  %s122_s14, 128, %s286_s5, [#allocation4]  }
  0xca   :  { %223 = dma.done.wait [#allocation4], 128  }
  0xcb   :  { %224 = vsyncadd [#allocation4], 4294967168 }
  0xcc   :  { %128 = vsyncpa [#allocation3], 1 }
  0xcd   :  { %129 = vsyncpa [#allocation7], 1 }
  0xce   :  { %130 = vsyncpa [#allocation4], 1 }
  0xcf   :  { %131 = vsyncpa [#allocation5], 1 }

</bundles_post_ra>
